<compile_context>
chip_gen: v7x
topology: tpu7x:2x2x1
jax: 0.10.0
libtpu: 0.0.40
codegen_flags: <defaults>
</compile_context>

<pallas_src>
import math
import functools

import jax
import jax.numpy as jnp
from jax.experimental import pallas as pl
from jax.experimental.pallas import tpu as pltpu


# --------------------------------------------------------------------------- #
# Kernel
# --------------------------------------------------------------------------- #
def _pos_enc_kernel(x_ref, pe_ref, o_ref, *, xscale):
    # x_ref : (time_tile, D) VMEM, input dtype
    # pe_ref: (time_tile, D) VMEM, float32
    # o_ref : (time_tile, D) VMEM, input dtype
    x = x_ref[...].astype(jnp.float32)
    o_ref[...] = (x * xscale + pe_ref[...]).astype(o_ref.dtype)


# --------------------------------------------------------------------------- #
# Helpers
# --------------------------------------------------------------------------- #
def make_pe_table(max_len: int, d_model: int) -> jnp.ndarray:
    """Deterministic sin/cos positional-encoding table, shape (max_len, d_model)."""
    position = jnp.arange(0, max_len, dtype=jnp.float32)[:, None]              # (L, 1)
    div_term = jnp.exp(
        jnp.arange(0, d_model, 2, dtype=jnp.float32)
        * (-(math.log(10000.0) / d_model))
    )                                                                           # (D/2,)
    angles = position * div_term                                                # (L, D/2)
    pe = jnp.zeros((max_len, d_model), dtype=jnp.float32)
    pe = pe.at[:, 0::2].set(jnp.sin(angles))
    pe = pe.at[:, 1::2].set(jnp.cos(angles))
    return pe


def _round_up(n: int, m: int) -> int:
    return ((n + m - 1) // m) * m


def _vmem_capacity_bytes() -> int:
    """Physical VMEM per TensorCore; conservative 64 MiB fallback (v7x)."""
    try:
        info = pltpu.get_tpu_info()
        cap = int(getattr(info, "vmem_capacity_bytes", 64 * 1024 * 1024))
        return cap if cap > 0 else 64 * 1024 * 1024
    except Exception:
        return 64 * 1024 * 1024


def _target_block_bytes(vmem_cap: int) -> int:
    # ~5.3 MiB on v7x (64 MiB VMEM), 8 MiB on v5e/v6e (128 MiB VMEM),
    # floor of 2 MiB; keeps the double-buffered working set small vs capacity.
    return max(2 * 1024 * 1024, min(8 * 1024 * 1024, vmem_cap // 12))


def _choose_time_tile(T: int, D: int, B: int, dtype_bytes: int,
                      target_bytes: int) -> int:
    """Time tile that is a multiple of 8 (or the full T extent).

    Ragged final blocks are handled by a cdiv grid (Pallas masks them), so the
    tile does NOT need to divide T.
    """
    if T <= 8:
        return T
    per_row = max(1, D * dtype_bytes)
    tile = max(8, ((target_bytes // per_row) // 8) * 8)
    if tile >= T:
        tile = T
    # Guarantee >= 2 grid steps when possible (v7x has 2 TensorCores per chip).
    if B == 1 and tile == T:
        tile = max(8, _round_up((T + 1) // 2, 8))
        if tile >= T:
            tile = T
    return tile


# --------------------------------------------------------------------------- #
# Wrapper
# --------------------------------------------------------------------------- #
def positional_encoder_forward(x, pe_table, *, d_model, offset=0,
                               time_tile=None, donate_x=False):
    """
    Args:
      x:        (B, T, d_model) array
      pe_table: (max_len, d_model) float32 precomputed sin/cos table
      offset:   static int position offset
      donate_x: alias x's buffer for the output (caller must not reuse x)
    Returns:
      (x_out, pos_emb): shapes (B, T, d_model) [x.dtype] and (1, T, d_model) [float32]
    """
    B, T, D = x.shape
    assert D == d_model
    max_len = pe_table.shape[0]
    assert offset + T < max_len  # mirrors the PyTorch module's assertion
    xscale = math.sqrt(d_model)
    xb = jnp.dtype(x.dtype).itemsize

    # Static slice of the PE table (float32, like the PyTorch buffer).
    pe_slice = jax.lax.slice(pe_table, (offset, 0), (offset + T, D))    # (T, D) f32
    # pos_emb is exactly the pe slice -> return directly, never streamed via kernel.
    pos_emb = pe_slice[None, :, :]                                      # (1, T, D)

    # Per-generation block sizing.
    vmem_cap = _vmem_capacity_bytes()
    if time_tile is None:
        time_tile = _choose_time_tile(T, D, B, xb, _target_block_bytes(vmem_cap))
    assert time_tile == T or time_tile % 8 == 0

    grid = (B, pl.cdiv(T, time_tile))

    # Explicit VMEM limit: double-buffered x-in + x-out + pe blocks, plus slack,
    # capped well under physical VMEM (important on v7x's 64 MiB).
    x_block_bytes = time_tile * D * xb
    pe_block_bytes = time_tile * D * 4
    need = 4 * x_block_bytes + 2 * pe_block_bytes + (4 << 20)
    vmem_limit = int(min(max(need, 32 << 20), int(vmem_cap * 0.75)))

    kernel = functools.partial(_pos_enc_kernel, xscale=xscale)

    cost = pl.CostEstimate(
        flops=2 * B * T * D,
        transcendentals=0,
        bytes_accessed=2 * B * T * D * xb + T * D * 4,
    )

    x_out = pl.pallas_call(
        kernel,
        out_shape=jax.ShapeDtypeStruct((B, T, D), x.dtype),
        grid_spec=pltpu.PrefetchScalarGridSpec(
            num_scalar_prefetch=0,
            grid=grid,
            in_specs=[
                # Batch dim squeezed out of the kernel view; full D as last dim
                # (no lane-fold reshape -> no hidden HBM relayout copies).
                pl.BlockSpec((None, time_tile, D), lambda b, t: (b, t, 0)),
                pl.BlockSpec((time_tile, D), lambda b, t: (t, 0)),
            ],
            out_specs=pl.BlockSpec((None, time_tile, D), lambda b, t: (b, t, 0)),
        ),
        compiler_params=pltpu.CompilerParams(
            dimension_semantics=("parallel", "parallel"),
            vmem_limit_bytes=vmem_limit,
        ),
        cost_estimate=cost,
        input_output_aliases=({0: 0} if donate_x else {}),
    )(x, pe_slice)

    # TODO(synk): training-mode dropout (incl. independent dropout on pos_emb)
    # not implemented; eval-mode dropout is identity.
    return x_out, pos_emb


# --------------------------------------------------------------------------- #
# Demo / self-check
# --------------------------------------------------------------------------- #
if __name__ == "__main__":
    d_model = 32
    max_len = 64
    batch = 2
    time = 8
    offset = 0

    key = jax.random.PRNGKey(0)
    x = jax.random.normal(key, (batch, time, d_model), dtype=jnp.float32)

    pe_table = make_pe_table(max_len, d_model)

    x_out, pos_emb = positional_encoder_forward(
        x, pe_table, d_model=d_model, offset=offset
    )
    jax.block_until_ready((x_out, pos_emb))

    # Reference check in plain JAX.
    ref_pe = pe_table[offset:offset + time][None, :, :]
    ref_x = x * math.sqrt(d_model) + ref_pe
    assert x_out.shape == (batch, time, d_model)
    assert pos_emb.shape == (1, time, d_model)
    assert jnp.allclose(x_out, ref_x, atol=1e-5, rtol=1e-5)
    assert jnp.allclose(pos_emb, ref_pe, atol=1e-5, rtol=1e-5)

    print("KERNEL_OK")
</pallas_src>

<mosaic_0001>
module attributes {stable_mosaic.version = 11 : i64} {
  func.func @_pos_enc_kernel(%arg0: i32, %arg1: i32, %arg2: memref<1x8x32xf32, #tpu.memory_space<vmem>>, %arg3: memref<8x32xf32, #tpu.memory_space<vmem>>, %arg4: memref<1x8x32xf32, #tpu.memory_space<vmem>>) attributes {dimension_semantics = [#tpu.dimension_semantics<parallel>, #tpu.dimension_semantics<parallel>], iteration_bounds = array<i64: 2, 1>, scalar_prefetch = 0 : i64, scratch_operands = 0 : i64, tpu.core_type = #tpu.core_type<tc>, window_params = [{transform_indices = @transform_0, window_bounds = array<i64: 1, 8, 32>}, {transform_indices = @transform_1, window_bounds = array<i64: 8, 32>}, {transform_indices = @transform_2, window_bounds = array<i64: 1, 8, 32>}]} {
    %c0 = arith.constant 0 : index
    %c0_0 = arith.constant 0 : index
    %c0_1 = arith.constant 0 : index
    %0 = vector.load %arg2[%c0, %c0_0, %c0_1] : memref<1x8x32xf32, #tpu.memory_space<vmem>>, vector<1x8x32xf32>
    %1 = vector.shape_cast %0 : vector<1x8x32xf32> to vector<8x32xf32>
    %cst = arith.constant 5.65685415 : f32
    %2 = vector.broadcast %cst : f32 to vector<8x32xf32>
    %3 = arith.mulf %1, %2 : vector<8x32xf32>
    %c0_2 = arith.constant 0 : index
    %c0_3 = arith.constant 0 : index
    %4 = vector.load %arg3[%c0_2, %c0_3] : memref<8x32xf32, #tpu.memory_space<vmem>>, vector<8x32xf32>
    %5 = arith.addf %3, %4 : vector<8x32xf32>
    %c0_4 = arith.constant 0 : index
    %c0_5 = arith.constant 0 : index
    %c0_6 = arith.constant 0 : index
    %6 = vector.load %arg4[%c0_4, %c0_5, %c0_6] : memref<1x8x32xf32, #tpu.memory_space<vmem>>, vector<1x8x32xf32>
    %7 = vector.shape_cast %6 : vector<1x8x32xf32> to vector<8x32xf32>
    %8 = vector.shape_cast %5 : vector<8x32xf32> to vector<1x8x32xf32>
    tpu.vector_store %arg4[%c0_4, %c0_5, %c0_6], %8 {strides = array<i32>} : memref<1x8x32xf32, #tpu.memory_space<vmem>>, vector<1x8x32xf32>,
    return
  }
  func.func @transform_0(%arg0: i32, %arg1: i32) -> (i32, i32, i32) {
    %c0_i32 = arith.constant 0 : i32
    %c0_i32_0 = arith.constant 0 : i32
    return %arg0, %arg1, %c0_i32 : i32, i32, i32
  }
  func.func @transform_1(%arg0: i32, %arg1: i32) -> (i32, i32) {
    %c0_i32 = arith.constant 0 : i32
    %c0_i32_0 = arith.constant 0 : i32
    return %arg1, %c0_i32 : i32, i32
  }
  func.func @transform_2(%arg0: i32, %arg1: i32) -> (i32, i32, i32) {
    %c0_i32 = arith.constant 0 : i32
    %c0_i32_0 = arith.constant 0 : i32
    return %arg0, %arg1, %c0_i32 : i32, i32, i32
  }
}

</mosaic_0001>

<bundles_post_ra>
// kernel: tpu_custom_call.1
= control target key start
LH: loop header
LB: loop body
LE: loop exit
PB: predicated region body
PF: predicated region fallthrough
CT: control target
= control target key end

     0   :  { %7 = vsyncpa [#allocation3], 0  ;;  %s777_s0 = inlined_call_operand.hbm [shape: f32[2,8,32], index: 0, kind: input, shape index: {}]   ;;  %s778_s1 = inlined_call_operand.hbm [shape: f32[8,32], index: 1, kind: input, shape index: {}]   ;;  %s779_s2 = inlined_call_operand.hbm [shape: f32[2,8,32], index: 2, kind: output, shape index: {}]  }
   0x1   :  { %9 = vsyncpa [#allocation3 + $0x1], 0 }
   0x2   :  { %10 = vsyncpa [#allocation6], 0 }
   0x3   :  { %11 = vsyncpa [#allocation4], 0 }
   0x4   :  { %13 = vsyncpa [#allocation4 + $0x1], 0  ;;  %s561_s9 = smov 0   ;;  %s563_s10 = smov 0  }
   0x5   :  { %s565_s11 = smov 0   ;;  %s567_s12 = smov 0  }
   0x6   :  { %s569_s13 = smov 0   ;;  %s571_s14 = smov 0  }
   0x7 LB: > { %s309_s15 = sadd.s32 4294967295, %s541_s14   ;;  %s310_s16 = sadd.s32 4294967294, %s541_s14   ;;  %s541_s14 = sphi %s571_s14, %s19_s14   ;;  %s537_s13 = sphi %s569_s13, %s804_s13   ;;  %s533_s12 = sphi %s567_s12, %s803_s12   ;;  %s529_s11 = sphi %s565_s11, %s802_s11   ;;  %s525_s10 = sphi %s563_s10, %s801_s10   ;;  %s521_s9 = sphi %s561_s9, %s800_s9  }
   0x8   : > { %p53_p0 = scmp.ne.s32.totalorder %s525_s10, %s521_s9  ;;  %p595_p1 = scmp.eq.s32.totalorder %s309_s15, 0 }
   0x9   : > { %p599_p2 = scmp.eq.s32.totalorder %s309_s15, 1  ;;  %p111_p3 = scmp.eq.s32.totalorder %s310_s16, 1 }
   0xa   : > { %s784_s17 = scalar_select %p595_p1, 1, 0 }
   0xb   : > { %s785_s18 = scalar_select %p599_p2, 1, 0 }
   0xc   : > { %p605_p4 = por %p595_p1, %p53_p0  ;;  %p311_p5 = scmp.ge.s32.totalorder %s541_s14, 1 }
   0xd   : > { %p610_p6 = por %p111_p3, %p53_p0  ;;  %p118_p7 = scmp.lt.s32.totalorder %s541_s14, 3 }
   0xe   : > { %s786_s19 = scalar_select %p605_p4, 1, 0 }
   0xf   : > { %s787_s20 = scalar_select %p610_p6, 1, 0 }
  0x10   : > { %p615_p8 = pnand %p311_p5, %p118_p7  ;;  %s543_s22 = smov [#allocation5]  }
  0x11   : > { %s133_s23 = sshll.u32 %s543_s22, 4  ;;  %s31_s25 = sadd.s32 1, %s537_s13  ;;  %s134_s23 = int_to_ptr.vmem [resolvable:$true] %s133_s23 }
  0x12   : > { %s788_s21 = scalar_select %p615_p8, 1, 0 }
  0x13   : > { %p332_p10 = pneg %p615_p8  ;;  %s40_s26 = sadd.s32 1, %s529_s11 }
  0x14   : > { %p630_p12 = scmp.ge.s32.totalorder %s31_s25, 2  ;;  %s397_s30 = scalar_lea.hbm %s778_s1, 128 }
  0x15   : > { %p624_p11 = pnand %p332_p10, %p595_p1  ;;  %p398_p13 = scmp.ne.s32.totalorder %s778_s1, %s397_s30 }
  0x16   : > { %s790_s27 = scalar_select %p630_p12, 1, 0 }
  0x17   : > { %p399_p0 = pneg %p624_p11  ;;  %p404_p7 = scmp.lt.u32.totalorder %s397_s30, %s778_s1 }
  0x19   : > { %p400_p3 = pnand %p399_p0, %p398_p13 }
  0x1b   : > { %p401_p5 = pneg %p400_p3 }
  0x1d   : > { %p406_p10 = pnand %p404_p7, %p401_p5 }
  0x1f   : > { %409 = shalt.err (!%p406_p10)
}
  0x20   : > { %s410_s7 = scalar_lea.vmem %s134_s23, 128  ;;  %p418_p4 = scmp.lt.s32.totalorder %s134_s23, %s134_s23 }
  0x21   : > { %p411_p9 = scmp.ne.s32.totalorder %s134_s23, %s410_s7  ;;  %p419_p8 = scmp.lt.s32.totalorder %s410_s7, %s410_s7 }
  0x23   : > { %p413_p6 = pnand %p411_p9, %p399_p0  ;;  %p420_p2 = por %p419_p8, %p418_p4 }
  0x25   : > { %p414_p1 = pneg %p413_p6 }
  0x27   : > { %p421_p12 = pnand %p420_p2, %p414_p1 }
  0x29   : > { %424 = shalt.err (!%p421_p12)
}
  0x2a   : > { %335 = dma.hbm_to_vmem [thread:$0]  (!%p624_p11), %s778_s1, 128, %s134_s23, [#allocation6]  }
  0x2b   : > { %p791_p4 = scmp.ne.s32.totalorder %s790_s27, 0  ;;  %p47_p1 = scmp.ne.s32.totalorder %s529_s11, %s525_s10 }
  0x2c   : > { %p48_p2 = scmp.eq.s32.totalorder %s541_s14, 0  ;;  %p345_p6 = scmp.lt.s32.totalorder %s541_s14, 2 }
  0x2d   : > { %s806_s25 = smov (%p791_p4, %s31_s25), 0  ;;  %p792_p12 = scmp.ne.s32.totalorder %s785_s18, 0 }
  0x2e   : > { %s35_s16 = ssub.s32 %s537_s13, %s806_s25  ;;  %p49_p9 = por %p48_p2, %p47_p1 }
  0x2f   : > { %p38_p8 = scmp.eq.s32.totalorder %s35_s16, 0  ;;  %p662_p13 = por %p792_p12, %p47_p1 }
  0x30   : > { %s144_s24 = sand.u32 1, %s529_s11   ;;  %s315_s27 = sshll.u32 %s537_s13, 7 }
  0x31   : > { %s670_s28 = scalar_select %p38_p8, %s529_s11, %s40_s26  }
  0x32   : > { %s314_s23 = sshll.u32 %s144_s24, 3  ;;  %s676_s3 = scalar_lea.hbm %s777_s0, %s315_s27 }
  0x33   : > { %s148_s18 = scalar_lea.vmem [#allocation2], %s314_s23  ;;  %p680_p11 = pnand %p345_p6, %p49_p9 }
  0x34   : > { %s156_s4 = sshll.u32 %s148_s18, 4  ;;  %s145_s26 = scalar_lea.sflag [#allocation3], %s144_s24  ;;  %s678_s4 = int_to_ptr.vmem [resolvable:$true] %s156_s4 }
  0x35   : > { %s425_s6 = scalar_lea.hbm %s676_s3, 128  ;;  %p427_p3 = pneg %p680_p11 }
  0x36   : > { %p426_p0 = scmp.ne.s32.totalorder %s676_s3, %s425_s6  ;;  %s430_s15 = scalar_lea.hbm %s777_s0, 256 }
  0x37   : > { %p431_p10 = scmp.lt.u32.totalorder %s676_s3, %s777_s0  ;;  %p432_p4 = scmp.lt.u32.totalorder %s430_s15, %s425_s6 }
  0x38   : > { %p428_p5 = pnand %p427_p3, %p426_p0  ;;  %p434_p2 = scmp.lt.u32.totalorder %s425_s6, %s676_s3 }
  0x39   : > { %p433_p1 = por %p432_p4, %p431_p10 }
  0x3a   : > { %p429_p7 = pneg %p428_p5 }
  0x3b   : > { %p435_p6 = por %p434_p2, %p433_p1 }
  0x3d   : > { %p436_p8 = pnand %p435_p6, %p429_p7 }
  0x3f   : > { %439 = shalt.err (!%p436_p8)
}
  0x40   : > { %s440_s24 = scalar_lea.vmem %s678_s4, 128  ;;  %s544_s27 = smov [#allocation2]  }
  0x41   : > { %p441_p9 = scmp.ne.s32.totalorder %s678_s4, %s440_s24  ;;  %s445_s29 = sshll.u32 %s544_s27, 4  ;;  %s446_s29 = int_to_ptr.vmem [resolvable:$false] %s445_s29 }
  0x42   : > { %s447_s30 = scalar_lea.vmem %s446_s29, 256  ;;  %p448_p5 = scmp.lt.s32.totalorder %s678_s4, %s446_s29 }
  0x43   : > { %p443_p12 = pnand %p441_p9, %p427_p3  ;;  %p449_p10 = scmp.lt.s32.totalorder %s447_s30, %s440_s24 }
  0x45   : > { %p444_p0 = pneg %p443_p12  ;;  %p450_p4 = por %p449_p10, %p448_p5 }
  0x47   : > { %p451_p1 = pnand %p450_p4, %p444_p0 }
  0x49   : > { %454 = shalt.err (!%p451_p1)
}
  0x4a   : > { %339 = dma.hbm_to_vmem [thread:$0]  (!%p680_p11), %s676_s3, 128, %s678_s4, %s145_s26  }
  0x4b   : > { %p795_p7 = scmp.ne.s32.totalorder %s788_s21, 0 }
  0x4c   : > { %s712_s18 = sand.u32 (!%p795_p7), 1, %s525_s10   ;;  %p796_p3 = scmp.ne.s32.totalorder (!%p795_p7), %s786_s19, 0 }
  0x4d   : > { %165 = sbr.rel (%p795_p7) target bundleno = 113 (0x71), region = 28  ;;  %s317_s6 = sshll.u32 (!%p795_p7), %s712_s18, 3 }
  0x4e   : > { %s168_s7 = scalar_lea.sflag (!%p795_p7), [#allocation3], %s712_s18  ;;  %s171_s8 = scalar_lea.vmem (!%p795_p7), [#allocation2], %s317_s6 }
  0x54   : > { %508 = dma.done.wait (%p796_p3), %s168_s7, 128  }
  0x55   : > { %510 = vsyncadd (%p796_p3), %s168_s7, 4294967168  ;;  %p797_p2 = scmp.ne.s32.totalorder %s784_s17, 0 }
  0x57   : > { %512 = dma.done.wait (%p797_p2), [#allocation6], 128  }
  0x58   : > { %514 = vsyncadd (%p797_p2), [#allocation6], 4294967168  ;;  %v196_v0 = vld [vmem:[%s171_s8] sm:$0xff]  ;;  %v198_v1 = vld [vmem:[#allocation5] sm:$0xff]  ;;  %s195_s21 = scalar_lea.vmem [#allocation7], %s317_s6  ;;  %s321_s4 = sshll.u32 %s533_s12, 7 }
  0x59   : > { %s217_s3 = sshll.u32 %s195_s21, 4  ;;  %v197_v2 = vmul.f32 5.656854, %v196_v0  ;;  %vm200_vm0 = vcmask 261120   ;;  %s730_s17 = scalar_lea.hbm %s779_s2, %s321_s4  ;;  %s725_s3 = int_to_ptr.vmem [resolvable:$true] %s217_s3 }
  0x5a   : > { %s203_s26 = scalar_lea.sflag [#allocation4], %s712_s18  ;;  %s455_s15 = scalar_lea.vmem %s725_s3, 128 }
  0x5b   : > { %v199_v3 = vadd.f32 %v198_v1, %v197_v2  ;;  %p456_p11 = scmp.ne.s32.totalorder %s725_s3, %s455_s15  ;;  %s545_s12 = smov [#allocation7]  }
  0x5c   : > { %s459_s16 = sshll.u32 %s545_s12, 4  ;;  %s460_s16 = int_to_ptr.vmem [resolvable:$false] %s459_s16 }
  0x5d   : > { %201 = vst.msk [vmem:[%s195_s21] sm:$0xff] %vm200_vm0, %v199_v3  ;;  %p457_p6 = pnand %p456_p11, %p662_p13  ;;  %s461_s23 = scalar_lea.vmem %s460_s16, 256 }
  0x5e   : > { %p462_p9 = scmp.lt.s32.totalorder %s725_s3, %s460_s16  ;;  %p463_p12 = scmp.lt.s32.totalorder %s461_s23, %s455_s15 }
  0x5f   : > { %p458_p8 = pneg %p457_p6 }
  0x60   : > { %p464_p0 = por %p463_p12, %p462_p9 }
  0x62   : > { %p465_p5 = pnand %p464_p0, %p458_p8 }
  0x64   : > { %468 = shalt.err (!%p465_p5)
}
  0x65   : > { %s469_s24 = scalar_lea.hbm %s730_s17, 128  ;;  %s473_s30 = scalar_lea.hbm %s779_s2, 256 }
  0x66   : > { %p470_p10 = scmp.ne.s32.totalorder %s730_s17, %s469_s24  ;;  %p474_p7 = scmp.lt.u32.totalorder %s730_s17, %s779_s2 }
  0x67   : > { %p475_p3 = scmp.lt.u32.totalorder %s473_s30, %s469_s24  ;;  %p477_p11 = scmp.lt.u32.totalorder %s469_s24, %s730_s17 }
  0x68   : > { %p471_p4 = pnand %p470_p10, %p662_p13 }
  0x69   : > { %p476_p2 = por %p475_p3, %p474_p7 }
  0x6a   : > { %p472_p1 = pneg %p471_p4 }
  0x6b   : > { %p478_p6 = por %p477_p11, %p476_p2 }
  0x6d   : > { %p479_p8 = pnand %p478_p6, %p472_p1 }
  0x6f   : > { %482 = shalt.err (!%p479_p8)
}
  0x70   : > { %330 = dma.vmem_to_hbm [thread:$0]  (%p662_p13), %s725_s3, 128, %s730_s17, %s203_s26  }
  0x71 PF: > { %s229_s7 = sand.u32 1, %s521_s9   ;;  %p798_p9 = scmp.ne.s32.totalorder %s787_s20, 0 }
  0x72   : > { %p799_p12 = scmp.ge.s32.totalorder %s541_s14, 2  ;;  %s230_s8 = scalar_lea.sflag [#allocation4], %s229_s7 }
  0x74   : > { %p341_p0 = pnand %p799_p12, %p798_p9 }
  0x76   : > { %516 = dma.done.wait (!%p341_p0), %s230_s8, 128  }
  0x77   : > { %518 = vsyncadd (!%p341_p0), %s230_s8, 4294967168  ;;  %s19_s14 = sadd.s32 1, %s541_s14   ;;  %s800_s9 = smov %s525_s10 }
  0x78   : > { %p16_p5 = scmp.ge.s32.totalorder %s19_s14, 4   ;;  %s801_s10 = smov %s529_s11 }
  0x79   : > { %s802_s11 = smov %s670_s28  ;;  %s803_s12 = smov %s537_s13 }
  0x7a   : > { %s804_s13 = smov %s806_s25  ;;  %18 = sbr.rel (!%p16_p5) target bundleno = 7 (0x7), region = 78 }
  0x81   :  { %235 = vsyncpa [#allocation3], 1 }
  0x82   :  { %237 = vsyncpa [#allocation3 + $0x1], 1 }
  0x83   :  { %238 = vsyncpa [#allocation6], 1 }
  0x84   :  { %239 = vsyncpa [#allocation4], 1 }
  0x85   :  { %241 = vsyncpa [#allocation4 + $0x1], 1 }

</bundles_post_ra>
